<compile_context>
chip_gen: v5e
topology: v5e:2x2
jax: 0.10.0
libtpu: 0.0.40
codegen_flags: <defaults>
</compile_context>

<pallas_src>
import functools

import jax
import jax.numpy as jnp
from jax.experimental import pallas as pl
from jax.experimental.pallas import tpu as pltpu

# n_input_size = len(get_state(env)) for the 4-vehicle V2X env:
#   V2I_fast(4) + V2V_fast(4*4) + V2V_interference(4) + V2I_abs(1)
#   + V2V_abs(4) + time_remaining(1) + load_remaining(1) = 31
N_INPUT = 31
H1, H2, H3, OUT = 500, 250, 120, 1


def _round_up(x, m):
    return ((x + m - 1) // m) * m


# Padded sizes (lane dim -> multiple of 128, batch -> multiple of 8).
N_INPUT_P = _round_up(N_INPUT, 128)   # 128
H1_P = _round_up(H1, 128)             # 512
H2_P = _round_up(H2, 128)             # 256
H3_P = _round_up(H3, 128)             # 128
OUT_P = _round_up(OUT, 128)           # 128 (lane-dense output stores)

_MAX_TB = 2048          # max batch-tile rows (~15 MiB VMEM at this size)
_SINGLE_TILE_MAX = 512  # batches up to this run as one grid step


def critic_kernel(x_ref, w1_ref, b1_ref, w2_ref, b2_ref,
                  w3_ref, b3_ref, w4_ref, b4_ref, o_ref):
    """One batch tile through the whole MLP.  Weights are VMEM-resident."""
    # x arrives already in bf16; fc1-fc3: bf16 MXU matmuls, f32 accumulation.
    h = jnp.dot(x_ref[...], w1_ref[...],
                preferred_element_type=jnp.float32) + b1_ref[...]
    h = jnp.maximum(h, 0.0).astype(jnp.bfloat16)
    h = jnp.dot(h, w2_ref[...],
                preferred_element_type=jnp.float32) + b2_ref[...]
    h = jnp.maximum(h, 0.0).astype(jnp.bfloat16)
    h = jnp.dot(h, w3_ref[...],
                preferred_element_type=jnp.float32) + b3_ref[...]
    h = jnp.maximum(h, 0.0)  # stays f32: the value head is computed in f32
    o_ref[...] = (jnp.dot(h, w4_ref[...], preferred_element_type=jnp.float32)
                  + b4_ref[...])


def prepare_params(params):
    """Pad params to TPU-friendly shapes ONCE (at init / after each update).

    w1..w3 -> bf16 with shape (in_p, out_p) (transposed vs. PyTorch so the
    kernel computes y = x @ W + b); w4 (value head) stays f32; biases -> f32
    with shape (1, out_p).  Zero padding is exact.
    """
    def padw(a, r, c, dtype):
        a = jnp.asarray(a, jnp.float32)
        return jnp.pad(a, ((0, r - a.shape[0]), (0, c - a.shape[1]))).astype(dtype)

    def padb(a, c):
        a = jnp.asarray(a, jnp.float32)
        return jnp.pad(a, (0, c - a.shape[0])).reshape(1, c)

    return {
        "w1": padw(params["w1"], N_INPUT_P, H1_P, jnp.bfloat16),
        "b1": padb(params["b1"], H1_P),
        "w2": padw(params["w2"], H1_P, H2_P, jnp.bfloat16),
        "b2": padb(params["b2"], H2_P),
        "w3": padw(params["w3"], H2_P, H3_P, jnp.bfloat16),
        "b3": padb(params["b3"], H3_P),
        "w4": padw(params["w4"], H3_P, OUT_P, jnp.float32),   # value head: f32
        "b4": padb(params["b4"], OUT_P),
    }


_SINGLE_BUFFER_OK = None


def _single_buffer_supported():
    """Probe (once) whether pl.Buffered(1) single-buffering of constant-index
    inputs lowers on this JAX/Mosaic version; fall back to default
    double-buffering otherwise, so the kernel always compiles."""
    global _SINGLE_BUFFER_OK
    if _SINGLE_BUFFER_OK is not None:
        return _SINGLE_BUFFER_OK
    try:
        buffered = getattr(pl, "Buffered", None)
        if buffered is None:
            raise TypeError("pl.Buffered unavailable")

        def _probe_kernel(x_ref, o_ref):
            o_ref[...] = x_ref[...] + 1.0

        f = pl.pallas_call(
            _probe_kernel,
            out_shape=jax.ShapeDtypeStruct((8, 128), jnp.float32),
            grid=(2,),
            in_specs=[pl.BlockSpec((8, 128), lambda i: (0, 0),
                                   pipeline_mode=buffered(1))],
            out_specs=pl.BlockSpec((8, 128), lambda i: (0, 0)),
        )
        jax.block_until_ready(f(jnp.zeros((8, 128), jnp.float32)))
        _SINGLE_BUFFER_OK = True
    except Exception:  # any construction/lowering failure => safe fallback
        _SINGLE_BUFFER_OK = False
    return _SINGLE_BUFFER_OK


def _batch_bucket(b):
    """Round the batch up to a power of two (>= 8) so varying RL batch sizes
    hit a small, fixed set of compiled kernels (no per-B recompiles)."""
    p = 8
    while p < b:
        p *= 2
    return p


def _select_tile(b_p):
    """b_p is a power of two >= 8.  Up to 512 rows: one grid step (minimum
    per-step overhead on single-TC v5e/v6e).  Larger: >= 2 equal tiles so the
    v7x megacore can shard the batch; capped at _MAX_TB to bound VMEM."""
    if b_p <= _SINGLE_TILE_MAX:
        return b_p
    return min(max(b_p // 2, 8), _MAX_TB)


def _vmem_limit_bytes(tb, single_buf_weights):
    """Scoped-VMEM limit sized from the actual buffers (v5e default is 16 MiB,
    too small for the largest tile); capped below v7x's 64 MiB physical."""
    wbuf = 1 if single_buf_weights else 2
    weights = wbuf * (2 * (N_INPUT_P * H1_P + H1_P * H2_P + H2_P * H3_P)  # bf16
                      + 4 * H3_P * OUT_P                                  # f32 w4
                      + 4 * (H1_P + H2_P + H3_P + OUT_P))                 # biases
    acts = tb * (2 * N_INPUT_P * 2      # x bf16, double-buffered
                 + 2 * OUT_P * 4        # out f32, double-buffered
                 + H1_P * (4 + 2)       # h1 f32 + bf16 copy
                 + H2_P * (4 + 2)       # h2 f32 + bf16 copy
                 + H3_P * 4)            # h3 f32 (value-head input)
    est = weights + acts
    return int(min(max(2 * est, 32 << 20), 48 << 20))


@functools.partial(jax.jit, static_argnames=("single_buf_weights",))
def _critic_forward_padded(x_b, pp, *, single_buf_weights):
    """x_b: (b_p, N_INPUT) f32 with b_p a power-of-two bucket >= 8."""
    b_p = x_b.shape[0]
    tb = _select_tile(b_p)
    grid = (b_p // tb,)

    # Single fusible pad: bf16 cast + feature pad to the 128-lane boundary.
    x_p = jnp.pad(x_b.astype(jnp.bfloat16), ((0, 0), (0, N_INPUT_P - N_INPUT)))

    pmode = pl.Buffered(1) if single_buf_weights else None

    def const_spec(shape):
        # Constant block index across the grid -> stays resident in VMEM with
        # no per-step re-DMA; single-buffered when supported (never changes).
        if pmode is not None:
            return pl.BlockSpec(shape, lambda i: (0, 0), pipeline_mode=pmode)
        return pl.BlockSpec(shape, lambda i: (0, 0))

    out_p = pl.pallas_call(
        critic_kernel,
        out_shape=jax.ShapeDtypeStruct((b_p, OUT_P), jnp.float32),
        grid=grid,
        in_specs=[
            pl.BlockSpec((tb, N_INPUT_P), lambda i: (i, 0)),   # x: batch-tiled
            const_spec((N_INPUT_P, H1_P)), const_spec((1, H1_P)),
            const_spec((H1_P, H2_P)),      const_spec((1, H2_P)),
            const_spec((H2_P, H3_P)),      const_spec((1, H3_P)),
            const_spec((H3_P, OUT_P)),     const_spec((1, OUT_P)),
        ],
        out_specs=pl.BlockSpec((tb, OUT_P), lambda i: (i, 0)),
        compiler_params=pltpu.CompilerParams(
            dimension_semantics=("parallel",),   # megacore batch sharding (v7x)
            vmem_limit_bytes=_vmem_limit_bytes(tb, single_buf_weights)),
    )(x_p, pp["w1"], pp["b1"], pp["w2"], pp["b2"],
      pp["w3"], pp["b3"], pp["w4"], pp["b4"])

    return out_p[:, :OUT]


def critic_forward(x, pp):
    """x: (B, N_INPUT) float.  pp: output of prepare_params.  Returns (B, 1) f32."""
    assert x.ndim == 2 and x.shape[1] == N_INPUT, x.shape
    b = x.shape[0]
    b_p = _batch_bucket(b)
    if b_p != b:
        x = jnp.pad(x, ((0, b_p - b), (0, 0)))   # bucketed batch => few compiles
    out = _critic_forward_padded(
        x, pp, single_buf_weights=_single_buffer_supported())
    return out[:b]


def init_params(key):
    """Deterministic init matching the PyTorch module:
       weights ~ N(0, 0.1); biases use nn.Linear default U(-1/sqrt(in), 1/sqrt(in))."""
    ks = jax.random.split(key, 8)

    def w(k, fan_in, fan_out):
        return 0.1 * jax.random.normal(k, (fan_in, fan_out), jnp.float32)

    def b(k, fan_in, fan_out):
        bound = 1.0 / jnp.sqrt(float(fan_in))
        return jax.random.uniform(k, (fan_out,), jnp.float32, -bound, bound)

    return {
        "w1": w(ks[0], N_INPUT, H1), "b1": b(ks[1], N_INPUT, H1),
        "w2": w(ks[2], H1, H2),      "b2": b(ks[3], H1, H2),
        "w3": w(ks[4], H2, H3),      "b3": b(ks[5], H2, H3),
        "w4": w(ks[6], H3, OUT),     "b4": b(ks[7], H3, OUT),
    }


def critic_ref_f32(x, p):
    """Pure-JAX f32 reference of the original PyTorch forward."""
    h = jax.nn.relu(x @ p["w1"] + p["b1"])
    h = jax.nn.relu(h @ p["w2"] + p["b2"])
    h = jax.nn.relu(h @ p["w3"] + p["b3"])
    return h @ p["w4"] + p["b4"]


def critic_ref_mixed(x, p):
    """Pure-JAX reference following the kernel's numeric path:
    bf16 weights/activations + f32 accumulation for fc1-fc3, f32 value head."""
    def lin_bf16(h, w, b):
        return jnp.dot(h.astype(jnp.bfloat16), w.astype(jnp.bfloat16),
                       preferred_element_type=jnp.float32) + b
    h = jax.nn.relu(lin_bf16(x, p["w1"], p["b1"]))
    h = jax.nn.relu(lin_bf16(h, p["w2"], p["b2"]))
    h = jax.nn.relu(lin_bf16(h, p["w3"], p["b3"]))
    return jnp.dot(h, p["w4"], preferred_element_type=jnp.float32) + p["b4"]


if __name__ == "__main__":
    key = jax.random.PRNGKey(0)
    k_param, k_x, k_x2 = jax.random.split(key, 3)
    params = init_params(k_param)
    pparams = prepare_params(params)          # one-time padding + bf16 cast

    # Per-env-step sized batch (single grid step).
    B = 4
    x = jax.random.normal(k_x, (B, N_INPUT), jnp.float32)
    out = jax.block_until_ready(critic_forward(x, pparams))
    assert out.shape == (B, OUT), out.shape

    ref_mixed = critic_ref_mixed(x, params)   # same numeric path as kernel
    ref_f32 = critic_ref_f32(x, params)       # original module semantics
    assert jnp.allclose(out, ref_mixed, atol=2e-2, rtol=2e-2), (out, ref_mixed)
    assert jnp.allclose(out, ref_f32, atol=1.5e-1, rtol=1e-1), (out, ref_f32)

    # Training-sized batch: bucketed to 1024 rows -> two 512-row tiles
    # (exercises the multi-tile / megacore-splittable path).
    B2 = 600
    x2 = jax.random.normal(k_x2, (B2, N_INPUT), jnp.float32)
    out2 = jax.block_until_ready(critic_forward(x2, pparams))
    assert out2.shape == (B2, OUT), out2.shape
    ref2 = critic_ref_mixed(x2, params)
    assert jnp.allclose(out2, ref2, atol=2e-2, rtol=2e-2)

    print("KERNEL_OK")
</pallas_src>

<mosaic_0001>
module attributes {stable_mosaic.version = 11 : i64} {
  func.func @_probe_kernel(%arg0: i32, %arg1: memref<8x128xf32, #tpu.memory_space<vmem>>, %arg2: memref<8x128xf32, #tpu.memory_space<vmem>>) attributes {dimension_semantics = [#tpu.dimension_semantics<arbitrary>], iteration_bounds = array<i64: 2>, scalar_prefetch = 0 : i64, scratch_operands = 0 : i64, tpu.core_type = #tpu.core_type<tc>, window_params = [{pipeline_mode = #tpu.pipeline_mode<synchronous>, transform_indices = @transform_0, window_bounds = array<i64: 8, 128>}, {pipeline_mode = #tpu.pipeline_mode<synchronous>, transform_indices = @transform_1, window_bounds = array<i64: 8, 128>}]} {
    %c0 = arith.constant 0 : index
    %c0_0 = arith.constant 0 : index
    %0 = vector.load %arg1[%c0, %c0_0] : memref<8x128xf32, #tpu.memory_space<vmem>>, vector<8x128xf32>
    %cst = arith.constant 1.000000e+00 : f32
    %1 = vector.broadcast %cst : f32 to vector<8x128xf32>
    %2 = arith.addf %0, %1 : vector<8x128xf32>
    %c0_1 = arith.constant 0 : index
    %c0_2 = arith.constant 0 : index
    %3 = vector.load %arg2[%c0_1, %c0_2] : memref<8x128xf32, #tpu.memory_space<vmem>>, vector<8x128xf32>
    tpu.vector_store %arg2[%c0_1, %c0_2], %2 {strides = array<i32>} : memref<8x128xf32, #tpu.memory_space<vmem>>, vector<8x128xf32>,
    return
  }
  func.func @transform_0(%arg0: i32) -> (i32, i32) {
    %c0_i32 = arith.constant 0 : i32
    %c0_i32_0 = arith.constant 0 : i32
    %c0_i32_1 = arith.constant 0 : i32
    return %c0_i32, %c0_i32_0 : i32, i32
  }
  func.func @transform_1(%arg0: i32) -> (i32, i32) {
    %c0_i32 = arith.constant 0 : i32
    %c0_i32_0 = arith.constant 0 : i32
    %c0_i32_1 = arith.constant 0 : i32
    return %c0_i32, %c0_i32_0 : i32, i32
  }
}

module attributes {stable_mosaic.version = 11 : i64} {
  func.func @critic_kernel(%arg0: i32, %arg1: memref<8x128xbf16, #tpu.memory_space<vmem>>, %arg2: memref<128x512xbf16, #tpu.memory_space<vmem>>, %arg3: memref<1x512xf32, #tpu.memory_space<vmem>>, %arg4: memref<512x256xbf16, #tpu.memory_space<vmem>>, %arg5: memref<1x256xf32, #tpu.memory_space<vmem>>, %arg6: memref<256x128xbf16, #tpu.memory_space<vmem>>, %arg7: memref<1x128xf32, #tpu.memory_space<vmem>>, %arg8: memref<128x128xf32, #tpu.memory_space<vmem>>, %arg9: memref<1x128xf32, #tpu.memory_space<vmem>>, %arg10: memref<8x128xf32, #tpu.memory_space<vmem>>) attributes {dimension_semantics = [#tpu.dimension_semantics<parallel>], iteration_bounds = array<i64: 1>, scalar_prefetch = 0 : i64, scratch_operands = 0 : i64, tpu.core_type = #tpu.core_type<tc>, window_params = [{transform_indices = @transform_0, window_bounds = array<i64: 8, 128>}, {pipeline_mode = #tpu.pipeline_mode<synchronous>, transform_indices = @transform_1, window_bounds = array<i64: 128, 512>}, {pipeline_mode = #tpu.pipeline_mode<synchronous>, transform_indices = @transform_2, window_bounds = array<i64: 1, 512>}, {pipeline_mode = #tpu.pipeline_mode<synchronous>, transform_indices = @transform_3, window_bounds = array<i64: 512, 256>}, {pipeline_mode = #tpu.pipeline_mode<synchronous>, transform_indices = @transform_4, window_bounds = array<i64: 1, 256>}, {pipeline_mode = #tpu.pipeline_mode<synchronous>, transform_indices = @transform_5, window_bounds = array<i64: 256, 128>}, {pipeline_mode = #tpu.pipeline_mode<synchronous>, transform_indices = @transform_6, window_bounds = array<i64: 1, 128>}, {pipeline_mode = #tpu.pipeline_mode<synchronous>, transform_indices = @transform_7, window_bounds = array<i64: 128, 128>}, {pipeline_mode = #tpu.pipeline_mode<synchronous>, transform_indices = @transform_8, window_bounds = array<i64: 1, 128>}, {transform_indices = @transform_9, window_bounds = array<i64: 8, 128>}]} {
    %c0 = arith.constant 0 : index
    %c0_0 = arith.constant 0 : index
    %0 = vector.load %arg1[%c0, %c0_0] : memref<8x128xbf16, #tpu.memory_space<vmem>>, vector<8x128xbf16>
    %c0_1 = arith.constant 0 : index
    %c0_2 = arith.constant 0 : index
    %1 = vector.load %arg2[%c0_1, %c0_2] : memref<128x512xbf16, #tpu.memory_space<vmem>>, vector<128x512xbf16>
    %cst = arith.constant dense<0.000000e+00> : vector<8x512xf32>
    %2 = tpu.matmul %0, %1, %cst {dimension_numbers = #tpu.dot_dimension_numbers<[1], [0], [0], [1], [0, 0, 1, 1], [], []>} : vector<8x128xbf16>, vector<128x512xbf16>, vector<8x512xf32> -> vector<8x512xf32>
    %c0_3 = arith.constant 0 : index
    %c0_4 = arith.constant 0 : index
    %3 = vector.load %arg3[%c0_3, %c0_4] : memref<1x512xf32, #tpu.memory_space<vmem>>, vector<1x512xf32>
    %4 = vector.broadcast %3 : vector<1x512xf32> to vector<8x512xf32>
    %5 = arith.addf %2, %4 : vector<8x512xf32>
    %cst_5 = arith.constant 0.000000e+00 : f32
    %6 = vector.broadcast %cst_5 : f32 to vector<8x512xf32>
    %7 = arith.maximumf %5, %6 : vector<8x512xf32>
    %8 = arith.truncf %7 : vector<8x512xf32> to vector<8x512xbf16>
    %c0_6 = arith.constant 0 : index
    %c0_7 = arith.constant 0 : index
    %9 = vector.load %arg4[%c0_6, %c0_7] : memref<512x256xbf16, #tpu.memory_space<vmem>>, vector<512x256xbf16>
    %cst_8 = arith.constant dense<0.000000e+00> : vector<8x256xf32>
    %10 = tpu.matmul %8, %9, %cst_8 {dimension_numbers = #tpu.dot_dimension_numbers<[1], [0], [0], [1], [0, 0, 1, 1], [], []>} : vector<8x512xbf16>, vector<512x256xbf16>, vector<8x256xf32> -> vector<8x256xf32>
    %c0_9 = arith.constant 0 : index
    %c0_10 = arith.constant 0 : index
    %11 = vector.load %arg5[%c0_9, %c0_10] : memref<1x256xf32, #tpu.memory_space<vmem>>, vector<1x256xf32>
    %12 = vector.broadcast %11 : vector<1x256xf32> to vector<8x256xf32>
    %13 = arith.addf %10, %12 : vector<8x256xf32>
    %cst_11 = arith.constant 0.000000e+00 : f32
    %14 = vector.broadcast %cst_11 : f32 to vector<8x256xf32>
    %15 = arith.maximumf %13, %14 : vector<8x256xf32>
    %16 = arith.truncf %15 : vector<8x256xf32> to vector<8x256xbf16>
    %c0_12 = arith.constant 0 : index
    %c0_13 = arith.constant 0 : index
    %17 = vector.load %arg6[%c0_12, %c0_13] : memref<256x128xbf16, #tpu.memory_space<vmem>>, vector<256x128xbf16>
    %cst_14 = arith.constant dense<0.000000e+00> : vector<8x128xf32>
    %18 = tpu.matmul %16, %17, %cst_14 {dimension_numbers = #tpu.dot_dimension_numbers<[1], [0], [0], [1], [0, 0, 1, 1], [], []>} : vector<8x256xbf16>, vector<256x128xbf16>, vector<8x128xf32> -> vector<8x128xf32>
    %c0_15 = arith.constant 0 : index
    %c0_16 = arith.constant 0 : index
    %19 = vector.load %arg7[%c0_15, %c0_16] : memref<1x128xf32, #tpu.memory_space<vmem>>, vector<1x128xf32>
    %20 = vector.broadcast %19 : vector<1x128xf32> to vector<8x128xf32>
    %21 = arith.addf %18, %20 : vector<8x128xf32>
    %cst_17 = arith.constant 0.000000e+00 : f32
    %22 = vector.broadcast %cst_17 : f32 to vector<8x128xf32>
    %23 = arith.maximumf %21, %22 : vector<8x128xf32>
    %c0_18 = arith.constant 0 : index
    %c0_19 = arith.constant 0 : index
    %24 = vector.load %arg8[%c0_18, %c0_19] : memref<128x128xf32, #tpu.memory_space<vmem>>, vector<128x128xf32>
    %cst_20 = arith.constant dense<0.000000e+00> : vector<8x128xf32>
    %25 = tpu.matmul %23, %24, %cst_20 {dimension_numbers = #tpu.dot_dimension_numbers<[1], [0], [0], [1], [0, 0, 1, 1], [], []>} : vector<8x128xf32>, vector<128x128xf32>, vector<8x128xf32> -> vector<8x128xf32>
    %c0_21 = arith.constant 0 : index
    %c0_22 = arith.constant 0 : index
    %26 = vector.load %arg9[%c0_21, %c0_22] : memref<1x128xf32, #tpu.memory_space<vmem>>, vector<1x128xf32>
    %27 = vector.broadcast %26 : vector<1x128xf32> to vector<8x128xf32>
    %28 = arith.addf %25, %27 : vector<8x128xf32>
    %c0_23 = arith.constant 0 : index
    %c0_24 = arith.constant 0 : index
    %29 = vector.load %arg10[%c0_23, %c0_24] : memref<8x128xf32, #tpu.memory_space<vmem>>, vector<8x128xf32>
    tpu.vector_store %arg10[%c0_23, %c0_24], %28 {strides = array<i32>} : memref<8x128xf32, #tpu.memory_space<vmem>>, vector<8x128xf32>,
    return
  }
  func.func @transform_0(%arg0: i32) -> (i32, i32) {
    %c0_i32 = arith.constant 0 : i32
    %c0_i32_0 = arith.constant 0 : i32
    return %arg0, %c0_i32 : i32, i32
  }
  func.func @transform_1(%arg0: i32) -> (i32, i32) {
    %c0_i32 = arith.constant 0 : i32
    %c0_i32_0 = arith.constant 0 : i32
    %c0_i32_1 = arith.constant 0 : i32
    return %c0_i32, %c0_i32_0 : i32, i32
  }
  func.func @transform_2(%arg0: i32) -> (i32, i32) {
    %c0_i32 = arith.constant 0 : i32
    %c0_i32_0 = arith.constant 0 : i32
    %c0_i32_1 = arith.constant 0 : i32
    return %c0_i32, %c0_i32_0 : i32, i32
  }
  func.func @transform_3(%arg0: i32) -> (i32, i32) {
    %c0_i32 = arith.constant 0 : i32
    %c0_i32_0 = arith.constant 0 : i32
    %c0_i32_1 = arith.constant 0 : i32
    return %c0_i32, %c0_i32_0 : i32, i32
  }
  func.func @transform_4(%arg0: i32) -> (i32, i32) {
    %c0_i32 = arith.constant 0 : i32
    %c0_i32_0 = arith.constant 0 : i32
    %c0_i32_1 = arith.constant 0 : i32
    return %c0_i32, %c0_i32_0 : i32, i32
  }
  func.func @transform_5(%arg0: i32) -> (i32, i32) {
    %c0_i32 = arith.constant 0 : i32
    %c0_i32_0 = arith.constant 0 : i32
    %c0_i32_1 = arith.constant 0 : i32
    return %c0_i32, %c0_i32_0 : i32, i32
  }
  func.func @transform_6(%arg0: i32) -> (i32, i32) {
    %c0_i32 = arith.constant 0 : i32
    %c0_i32_0 = arith.constant 0 : i32
    %c0_i32_1 = arith.constant 0 : i32
    return %c0_i32, %c0_i32_0 : i32, i32
  }
  func.func @transform_7(%arg0: i32) -> (i32, i32) {
    %c0_i32 = arith.constant 0 : i32
    %c0_i32_0 = arith.constant 0 : i32
    %c0_i32_1 = arith.constant 0 : i32
    return %c0_i32, %c0_i32_0 : i32, i32
  }
  func.func @transform_8(%arg0: i32) -> (i32, i32) {
    %c0_i32 = arith.constant 0 : i32
    %c0_i32_0 = arith.constant 0 : i32
    %c0_i32_1 = arith.constant 0 : i32
    return %c0_i32, %c0_i32_0 : i32, i32
  }
  func.func @transform_9(%arg0: i32) -> (i32, i32) {
    %c0_i32 = arith.constant 0 : i32
    %c0_i32_0 = arith.constant 0 : i32
    return %arg0, %c0_i32 : i32, i32
  }
}

</mosaic_0001>

<bundles_post_ra>
// kernel: tpu_custom_call.1
= control target key start
LH: loop header
LB: loop body
LE: loop exit
PB: predicated region body
PF: predicated region fallthrough
CT: control target
= control target key end

     0   :  { %6 = vsyncpa [#allocation3], 0  ;;  %s287_s0 = inlined_call_operand.hbm [shape: f32[8,128], index: 0, kind: input, shape index: {}]   ;;  %s288_s1 = inlined_call_operand.hbm [shape: f32[8,128], index: 1, kind: output, shape index: {}]  }
   0x1   :  { %7 = vsyncpa [#allocation4], 0  ;;  %s270_s6 = smov 0  }
   0x2 LB: > { %s149_s7 = sadd.s32 4294967295, %s256_s6   ;;  %p150_p0 = scmp.ge.s32.totalorder %s256_s6, 1  ;;  %s256_s6 = sphi %s270_s6, %s13_s6  }
   0x3   : > { %p60_p1 = scmp.lt.s32.totalorder %s256_s6, 3  ;;  %s72_s10 = sshll.u32 %s287_s0, 4  ;;  %s73_s10 = int_to_ptr.hbm [resolvable:$true] %s72_s10 }
   0x4   : > { %p170_p3 = scmp.eq.s32.totalorder %s149_s7, 0  ;;  %s258_s11 = smov [#allocation2]  }
   0x5   : > { %p61_p2 = pnand %p150_p0, %p60_p1  ;;  %s74_s12 = sshll.u32 %s258_s11, 4  ;;  %s75_s12 = int_to_ptr.vmem [resolvable:$true] %s74_s12 }
   0x7   : > { %p166_p4 = pneg %p61_p2  ;;  %87 = sbr.rel (%p61_p2) target bundleno = 20 (0x14), region = 24 }
   0x9   : > { %p167_p5 = pnand %p170_p3, %p166_p4 }
   0xb   : > { %169 = dma.hbm_to_vmem [thread:$0]  (!%p167_p5), %s73_s10, 128, %s75_s12, [#allocation3]  }
   0xc   : > { %247 = dma.done.wait (%p170_p3), [#allocation3], 128  }
   0xd   : > { %249 = vsyncadd (%p170_p3), [#allocation3], 4294967168  ;;  %s259_s13 = smov [#allocation5]   ;;  %s109_s17 = sshll.u32 %s288_s1, 4  ;;  %v98_v0 = vld [vmem:[#allocation2] sm:$0xff]  ;;  %s110_s17 = int_to_ptr.hbm [resolvable:$true] %s109_s17 }
   0xe   : > { %s107_s14 = sshll.u32 %s259_s13, 4  ;;  %p172_p6 = scmp.eq.s32.totalorder %s149_s7, 1  ;;  %v99_v1 = vadd.f32 1.0, %v98_v0  ;;  %s108_s14 = int_to_ptr.vmem [resolvable:$true] %s107_s14 }
  0x10   : > { %100 = vst [vmem:[#allocation5] sm:$0xff] %v99_v1 }
  0x11   : > { %163 = dma.vmem_to_hbm [thread:$0]  (%p172_p6), %s108_s14, 128, %s110_s17, [#allocation4]  }
  0x12   : > { %251 = dma.done.wait (%p172_p6), [#allocation4], 128  }
  0x13   : > { %253 = vsyncadd (%p172_p6), [#allocation4], 4294967168 }
  0x14 PF: > { %s13_s6 = sadd.s32 1, %s256_s6  }
  0x15   : > { %p10_p7 = scmp.ge.s32.totalorder %s13_s6, 4  }
  0x17   :  { %12 = sbr.rel (!%p10_p7) target bundleno = 2 (0x2), region = 53 }
  0x1c   :  { %123 = vsyncpa [#allocation3], 1 }
  0x1d   :  { %125 = vsyncpa [#allocation3 + $0x1], 1 }
  0x1e   :  { %126 = vsyncpa [#allocation4], 1 }
  0x1f   :  { %128 = vsyncpa [#allocation4 + $0x1], 1 }

// kernel: _critic_forward_padded.1
= control target key start
LH: loop header
LB: loop body
LE: loop exit
PB: predicated region body
PF: predicated region fallthrough
CT: control target
= control target key end

     0   :  { %14 = vsyncpa [#allocation3], 0  ;;  %s1827_s0 = inlined_call_operand.vmem [shape: bf16[8,128], index: 0, kind: input, shape index: {}]   ;;  %s1828_s1 = inlined_call_operand.hbm [shape: bf16[128,512], index: 1, kind: input, shape index: {}]   ;;  %s1829_s2 = inlined_call_operand.vmem [shape: f32[1,512], index: 2, kind: input, shape index: {}]   ;;  %s1830_s3 = inlined_call_operand.hbm [shape: bf16[512,256], index: 3, kind: input, shape index: {}]   ;;  %s1831_s4 = inlined_call_operand.vmem [shape: f32[1,256], index: 4, kind: input, shape index: {}]   ;;  %s1832_s5 = inlined_call_operand.hbm [shape: bf16[256,128], index: 5, kind: input, shape index: {}]   ;;  %s1833_s6 = inlined_call_operand.vmem [shape: f32[1,128], index: 6, kind: input, shape index: {}]   ;;  %s1834_s7 = inlined_call_operand.hbm [shape: f32[128,128], index: 7, kind: input, shape index: {}]   ;;  %s1835_s8 = inlined_call_operand.vmem [shape: f32[1,128], index: 8, kind: input, shape index: {}]   ;;  %s1836_s9 = inlined_call_operand.vmem [shape: f32[8,128], index: 9, kind: output, shape index: {}]  }
   0x1   :  { %15 = vsyncpa [#allocation5], 0  ;;  %s38_s11 = sshll.u32 %s1830_s3, 4  ;;  %s39_s11 = int_to_ptr.hbm [resolvable:$true] %s38_s11 }
   0x2   :  { %16 = vsyncpa [#allocation8], 0  ;;  %s1737_s12 = smov [#allocation4]   ;;  %s23_s16 = sshll.u32 %s1828_s1, 4  ;;  %s24_s16 = int_to_ptr.hbm [resolvable:$true] %s23_s16 }
   0x3   :  { %s40_s13 = sshll.u32 %s1737_s12, 4  ;;  %s1738_s17 = smov 128   ;;  %s41_s13 = int_to_ptr.vmem [resolvable:$true] %s40_s13 }
   0x4   :  { %s1739_s18 = smov 8   ;;  %s1740_s19 = smov [#allocation2]  }
   0x5   :  { %46 = dma.hbm_to_vmem [thread:$0]  %s39_s11, 8192, %s41_s13, [#allocation5], %s1738_s17, %s1738_s17, %s1739_s18  }
   0x6   :  { %s25_s20 = sshll.u32 %s1740_s19, 4  ;;  %s1741_s21 = smov 256   ;;  %s26_s20 = int_to_ptr.vmem [resolvable:$true] %s25_s20 }
   0x7   :  { %s1742_s22 = smov 16   ;;  %s53_s24 = sshll.u32 %s1832_s5, 4  ;;  %s54_s24 = int_to_ptr.hbm [resolvable:$true] %s53_s24 }
   0x8   :  { %31 = dma.hbm_to_vmem [thread:$0]  %s24_s16, 4096, %s26_s20, [#allocation3], %s1741_s21, %s1741_s21, %s1742_s22  }
   0x9   :  { %s1743_s25 = smov [#allocation6]   ;;  %s68_s28 = sshll.u32 %s1834_s7, 4  ;;  %s69_s28 = int_to_ptr.hbm [resolvable:$true] %s68_s28 }
   0xa   :  { %s55_s26 = sshll.u32 %s1743_s25, 4  ;;  %s1744_s29 = smov 64   ;;  %s56_s26 = int_to_ptr.vmem [resolvable:$true] %s55_s26 }
   0xb   :  { %s1745_s30 = smov 4   ;;  %s1746_s10 = smov [#allocation7]  }
   0xc   :  { %61 = dma.hbm_to_vmem [thread:$0]  %s54_s24, 2048, %s56_s26, [#allocation5], %s1744_s29, %s1744_s29, %s1745_s30  }
   0xd   :  { %s70_s11 = sshll.u32 %s1746_s10, 4  ;;  %s71_s11 = int_to_ptr.vmem [resolvable:$true] %s70_s11 }
   0xe   :  { %76 = dma.hbm_to_vmem [thread:$0]  %s69_s28, 2048, %s71_s11, [#allocation8], %s1738_s17, %s1738_s17, %s1739_s18  }
   0xf   :  { %1731 = dma.done.wait [#allocation3], 4096  }
  0x10   :  { %1732 = vsyncadd [#allocation3], 4294963200 }
  0x11   :  { %1733 = dma.done.wait [#allocation5], 10240  }
  0x12   :  { %1734 = vsyncadd [#allocation5], 4294957056 }
  0x13   :  { %1735 = dma.done.wait [#allocation8], 2048  }
  0x14   :  { %1736 = vsyncadd [#allocation8], 4294965248  ;;  %v1177_v0 = vld [vmem:[#allocation2 + $0xe0] sm:$0xf]  ;;  %v1541_v1 = vld [vmem:[#allocation2 + $0xec] sm:$0xf0] }
  0x15   :  { %v1539_v2 = vld [vmem:[#allocation2 + $0xe4] sm:$0xf]  ;;  %v1178_v3 = vor.u32 %v1541_v1, %v1177_v0  ;;  %v1179_v4 = vld [vmem:[#allocation2 + $0xf0] sm:$0xf0]  ;;  %v1185_v5 = vld [vmem:[#allocation2 + $0xe8] sm:$0xf] }
  0x16   :  { %v1542_v6 = vld [vmem:[#allocation2 + $0xf4] sm:$0xf0]  ;;  %v1182_v7 = vor.u32 %v1539_v2, %v1179_v4  ;;  %v1540_v9 = vld [vmem:[#allocation2 + $0xec] sm:$0xf]  ;;  %v1187_v10 = vld [vmem:[#allocation2 + $0xf8] sm:$0xf0] }
  0x17   :  { %v1186_v8 = vor.u32 %v1542_v6, %v1185_v5  ;;  %v1161_v11 = vld [vmem:[#allocation2 + $0xc0] sm:$0xf]  ;;  %298 = vmatpush.bf16.msra.mxu0 %v1178_v3  ;;  %v1190_v12 = vor.u32 %v1540_v9, %v1187_v10  ;;  %v1537_v13 = vld [vmem:[#allocation2 + $0xcc] sm:$0xf0]  ;;  %v1535_v14 = vld [vmem:[#allocation2 + $0xc4] sm:$0xf] }
  0x18   :  { %v1163_v15 = vld [vmem:[#allocation2 + $0xd0] sm:$0xf0]  ;;  %311 = vmatpush.bf16.msra.mxu1 %v1182_v7  ;;  %v1162_v16 = vor.u32 %v1537_v13, %v1161_v11  ;;  %v1169_v18 = vld [vmem:[#allocation2 + $0xc8] sm:$0xf]  ;;  %v1538_v19 = vld [vmem:[#allocation2 + $0xd4] sm:$0xf0] }
  0x19   :  { %324 = vmatpush.bf16.msra.mxu2 %v1186_v8  ;;  %v1166_v17 = vor.u32 %v1535_v14, %v1163_v15  ;;  %v1536_v20 = vld [vmem:[#allocation2 + $0xcc] sm:$0xf]  ;;  %337 = vmatpush.bf16.msra.mxu3 %v1190_v12  ;;  %v1170_v21 = vor.u32 %v1538_v19, %v1169_v18  ;;  %v1171_v22 = vld [vmem:[#allocation2 + $0xd8] sm:$0xf0]  ;;  %v1145_v23 = vld [vmem:[#allocation2 + $0xa0] sm:$0xf] }
  0x1a   :  { %v1533_v24 = vld [vmem:[#allocation2 + $0xac] sm:$0xf0]  ;;  %v1174_v25 = vor.u32 %v1536_v20, %v1171_v22  ;;  %v1531_v26 = vld [vmem:[#allocation2 + $0xa4] sm:$0xf]  ;;  %v1147_v27 = vld [vmem:[#allocation2 + $0xb0] sm:$0xf0] }
  0x1b   :  { %v1153_v28 = vld [vmem:[#allocation2 + $0xa8] sm:$0xf]  ;;  %299 = vmatpush.bf16.msra.mxu0 %v1162_v16  ;;  %v1146_v29 = vor.u32 %v1533_v24, %v1145_v23  ;;  %v1534_v30 = vld [vmem:[#allocation2 + $0xb4] sm:$0xf0]  ;;  %v1532_v31 = vld [vmem:[#allocation2 + $0xac] sm:$0xf]  ;;  %v1150_v33 = vor.u32 %v1531_v26, %v1147_v27 }
  0x1c   :  { %v1155_v32 = vld [vmem:[#allocation2 + $0xb8] sm:$0xf0]  ;;  %312 = vmatpush.bf16.msra.mxu1 %v1166_v17  ;;  %v1154_v34 = vor.u32 %v1534_v30, %v1153_v28  ;;  %v1129_v35 = vld [vmem:[#allocation2 + $0x80] sm:$0xf]  ;;  %v1529_v36 = vld [vmem:[#allocation2 + $0x8c] sm:$0xf0] }
  0x1d   :  { %325 = vmatpush.bf16.msra.mxu2 %v1170_v21  ;;  %v1527_v37 = vld [vmem:[#allocation2 + $0x84] sm:$0xf]  ;;  %338 = vmatpush.bf16.msra.mxu3 %v1174_v25  ;;  %v1158_v38 = vor.u32 %v1532_v31, %v1155_v32  ;;  %v1131_v39 = vld [vmem:[#allocation2 + $0x90] sm:$0xf0]  ;;  %v1137_v40 = vld [vmem:[#allocation2 + $0x88] sm:$0xf]  ;;  %v1130_v44 = vor.u32 %v1529_v36, %v1129_v35 }
  0x1e   :  { %v1530_v41 = vld [vmem:[#allocation2 + $0x94] sm:$0xf0]  ;;  %v1528_v42 = vld [vmem:[#allocation2 + $0x8c] sm:$0xf]  ;;  %v1139_v43 = vld [vmem:[#allocation2 + $0x98] sm:$0xf0]  ;;  %v1134_v45 = vor.u32 %v1527_v37, %v1131_v39 }
  0x1f   :  { %300 = vmatpush.bf16.msra.mxu0 %v1146_v29  ;;  %v1138_v46 = vor.u32 %v1530_v41, %v1137_v40  ;;  %v1113_v47 = vld [vmem:[#allocation2 + $0x60] sm:$0xf]  ;;  %v1525_v48 = vld [vmem:[#allocation2 + $0x6c] sm:$0xf0]  ;;  %v1523_v49 = vld [vmem:[#allocation2 + $0x64] sm:$0xf]  ;;  %v1142_v50 = vor.u32 %v1528_v42, %v1139_v43 }
  0x20   :  { %313 = vmatpush.bf16.msra.mxu1 %v1150_v33  ;;  %v1115_v51 = vld [vmem:[#allocation2 + $0x70] sm:$0xf0]  ;;  %v1121_v52 = vld [vmem:[#allocation2 + $0x68] sm:$0xf]  ;;  %v1526_v53 = vld [vmem:[#allocation2 + $0x74] sm:$0xf0]  ;;  %v1114_v56 = vor.u32 %v1525_v48, %v1113_v47 }
  0x21   :  { %326 = vmatpush.bf16.msra.mxu2 %v1154_v34  ;;  %339 = vmatpush.bf16.msra.mxu3 %v1158_v38  ;;  %v1524_v54 = vld [vmem:[#allocation2 + $0x6c] sm:$0xf]  ;;  %v1123_v55 = vld [vmem:[#allocation2 + $0x78] sm:$0xf0]  ;;  %v1118_v57 = vor.u32 %v1523_v49, %v1115_v51  ;;  %v1122_v58 = vor.u32 %v1526_v53, %v1121_v52  ;;  %v1097_v59 = vld [vmem:[#allocation2 + $0x40] sm:$0xf] }
  0x22   :  { %v1521_v60 = vld [vmem:[#allocation2 + $0x4c] sm:$0xf0]  ;;  %v1519_v61 = vld [vmem:[#allocation2 + $0x44] sm:$0xf]  ;;  %v1126_v62 = vor.u32 %v1524_v54, %v1123_v55  ;;  %v1099_v63 = vld [vmem:[#allocation2 + $0x50] sm:$0xf0] }
  0x23   :  { %301 = vmatpush.bf16.msra.mxu0 %v1130_v44  ;;  %v1105_v0 = vld [vmem:[#allocation2 + $0x48] sm:$0xf]  ;;  %v1522_v1 = vld [vmem:[#allocation2 + $0x54] sm:$0xf0]  ;;  %v1520_v2 = vld [vmem:[#allocation2 + $0x4c] sm:$0xf]  ;;  %v1098_v4 = vor.u32 %v1521_v60, %v1097_v59  ;;  %v1102_v5 = vor.u32 %v1519_v61, %v1099_v63 }
  0x24   :  { %314 = vmatpush.bf16.msra.mxu1 %v1134_v45  ;;  %v1107_v3 = vld [vmem:[#allocation2 + $0x58] sm:$0xf0]  ;;  %v1106_v6 = vor.u32 %v1522_v1, %v1105_v0  ;;  %v1081_v7 = vld [vmem:[#allocation2 + $0x20] sm:$0xf]  ;;  %v1517_v8 = vld [vmem:[#allocation2 + $0x2c] sm:$0xf0] }
  0x25   :  { %327 = vmatpush.bf16.msra.mxu2 %v1138_v46  ;;  %340 = vmatpush.bf16.msra.mxu3 %v1142_v50  ;;  %v1515_v9 = vld [vmem:[#allocation2 + $0x24] sm:$0xf]  ;;  %v1110_v10 = vor.u32 %v1520_v2, %v1107_v3  ;;  %v1083_v11 = vld [vmem:[#allocation2 + $0x30] sm:$0xf0]  ;;  %v1089_v12 = vld [vmem:[#allocation2 + $0x28] sm:$0xf]  ;;  %v1082_v16 = vor.u32 %v1517_v8, %v1081_v7 }
  0x26   :  { %v1518_v13 = vld [vmem:[#allocation2 + $0x34] sm:$0xf0]  ;;  %v1516_v14 = vld [vmem:[#allocation2 + $0x2c] sm:$0xf]  ;;  %v1091_v15 = vld [vmem:[#allocation2 + $0x38] sm:$0xf0]  ;;  %v1086_v18 = vor.u32 %v1515_v9, %v1083_v11 }
  0x27   :  { %302 = vmatpush.bf16.msra.mxu0 %v1114_v56  ;;  %v1065_v17 = vld [vmem:[#allocation2] sm:$0xf]  ;;  %v1090_v19 = vor.u32 %v1518_v13, %v1089_v12  ;;  %v1513_v20 = vld [vmem:[#allocation2 + $0xc] sm:$0xf0]  ;;  %v1511_v21 = vld [vmem:[#allocation2 + $0x4] sm:$0xf]  ;;  %v1094_v23 = vor.u32 %v1516_v14, %v1091_v15 }
  0x28   :  { %315 = vmatpush.bf16.msra.mxu1 %v1118_v57  ;;  %v1067_v22 = vld [vmem:[#allocation2 + $0x10] sm:$0xf0]  ;;  %v1073_v24 = vld [vmem:[#allocation2 + $0x8] sm:$0xf]  ;;  %v1514_v25 = vld [vmem:[#allocation2 + $0x14] sm:$0xf0]  ;;  %v1066_v30 = vor.u32 %v1513_v20, %v1065_v17 }
  0x29   :  { %328 = vmatpush.bf16.msra.mxu2 %v1122_v58  ;;  %341 = vmatpush.bf16.msra.mxu3 %v1126_v62  ;;  %v1512_v26 = vld [vmem:[#allocation2 + $0xc] sm:$0xf]  ;;  %v1075_v27 = vld [vmem:[#allocation2 + $0x18] sm:$0xf0]  ;;  %v1249_v28 = vld [vmem:[#allocation4 + $0x70] sm:$0xf]  ;;  %v1070_v33 = vor.u32 %v1511_v21, %v1067_v22  ;;  %v1074_v34 = vor.u32 %v1514_v25, %v1073_v24 }
  0x2a   :  { %v1558_v29 = vld [vmem:[#allocation4 + $0x74] sm:$0xf0]  ;;  %v1313_v31 = vld [vmem:[#allocation4 + $0xf0] sm:$0xf]  ;;  %v1078_v35 = vor.u32 %v1512_v26, %v1075_v27  ;;  %v1241_v37 = vld [vmem:[#allocation4 + $0x60] sm:$0xf] }
  0x2b   :  { %303 = vmatpush.bf16.msra.mxu0 %v1098_v4  ;;  %v1574_v32 = vld [vmem:[#allocation4 + $0xf4] sm:$0xf0]  ;;  %v1250_v36 = vor.u32 %v1558_v29, %v1249_v28  ;;  %v1377_v38 = vld [vmem:[#allocation4 + $0x170] sm:$0xf]  ;;  %v1556_v41 = vld [vmem:[#allocation4 + $0x64] sm:$0xf0] }
  0x2c   :  { %316 = vmatpush.bf16.msra.mxu1 %v1102_v5  ;;  %v1590_v39 = vld [vmem:[#allocation4 + $0x174] sm:$0xf0]  ;;  %v1314_v40 = vor.u32 %v1574_v32, %v1313_v31  ;;  %v1441_v42 = vld [vmem:[#allocation4 + $0x1f0] sm:$0xf]  ;;  %v95_v44 = vld [vmem:[%s1827_s0] sm:$0xf]  ;;  %v1242_v48 = vor.u32 %v1556_v41, %v1241_v37 }
  0x2d   :  { %329 = vmatpush.bf16.msra.mxu2 %v1106_v6  ;;  %342 = vmatpush.bf16.msra.mxu3 %v1110_v10  ;;  %v1606_v43 = vld [vmem:[#allocation4 + $0x1f4] sm:$0xf0]  ;;  %v1305_v45 = vld [vmem:[#allocation4 + $0xe0] sm:$0xf]  ;;  %v1572_v46 = vld [vmem:[#allocation4 + $0xe4] sm:$0xf0]  ;;  %v1378_v47 = vor.u32 %v1590_v39, %v1377_v38 }
  0x2e   :  { %v1442_v49 = vor.u32 %v1606_v43, %v1441_v42  ;;  %v1233_v50 = vld [vmem:[#allocation4 + $0x50] sm:$0xf]  ;;  %v1369_v51 = vld [vmem:[#allocation4 + $0x160] sm:$0xf]  ;;  %v1588_v52 = vld [vmem:[#allocation4 + $0x164] sm:$0xf0]  ;;  %v1306_v53 = vor.u32 %v1572_v46, %v1305_v45 }
  0x2f   :  { %304 = vmatpush.bf16.msra.mxu0 %v1082_v16  ;;  %v1554_v54 = vld [vmem:[#allocation4 + $0x54] sm:$0xf0]  ;;  %v1433_v55 = vld [vmem:[#allocation4 + $0x1e0] sm:$0xf]  ;;  %v1604_v56 = vld [vmem:[#allocation4 + $0x1e4] sm:$0xf0]  ;;  %v1370_v59 = vor.u32 %v1588_v52, %v1369_v51 }
  0x30   :  { %317 = vmatpush.bf16.msra.mxu1 %v1086_v18  ;;  %v1297_v57 = vld [vmem:[#allocation4 + $0xd0] sm:$0xf]  ;;  %v1570_v58 = vld [vmem:[#allocation4 + $0xd4] sm:$0xf0]  ;;  %v1234_v60 = vor.u32 %v1554_v54, %v1233_v50  ;;  %v1434_v61 = vor.u32 %v1604_v56, %v1433_v55  ;;  %v1225_v62 = vld [vmem:[#allocation4 + $0x40] sm:$0xf] }
  0x31   :  { %330 = vmatpush.bf16.msra.mxu2 %v1090_v19  ;;  %343 = vmatpush.bf16.msra.mxu3 %v1094_v23  ;;  %v1361_v63 = vld [vmem:[#allocation4 + $0x150] sm:$0xf]  ;;  %v1586_v0 = vld [vmem:[#allocation4 + $0x154] sm:$0xf0]  ;;  %v1298_v1 = vor.u32 %v1570_v58, %v1297_v57  ;;  %v1552_v2 = vld [vmem:[#allocation4 + $0x44] sm:$0xf0] }
  0x32   :  { %v1425_v3 = vld [vmem:[#allocation4 + $0x1d0] sm:$0xf]  ;;  %v1602_v4 = vld [vmem:[#allocation4 + $0x1d4] sm:$0xf0]  ;;  %v1289_v5 = vld [vmem:[#allocation4 + $0xc0] sm:$0xf]  ;;  %v1362_v7 = vor.u32 %v1586_v0, %v1361_v63  ;;  %v1226_v8 = vor.u32 %v1552_v2, %v1225_v62 }
  0x33   :  { %305 = vmatpush.bf16.msra.mxu0 %v1066_v30  ;;  %v1568_v6 = vld [vmem:[#allocation4 + $0xc4] sm:$0xf0]  ;;  %v1426_v9 = vor.u32 %v1602_v4, %v1425_v3  ;;  %v1217_v10 = vld [vmem:[#allocation4 + $0x30] sm:$0xf]  ;;  %v1353_v11 = vld [vmem:[#allocation4 + $0x140] sm:$0xf] }
  0x34   :  { %318 = vmatpush.bf16.msra.mxu1 %v1070_v33  ;;  %v1584_v12 = vld [vmem:[#allocation4 + $0x144] sm:$0xf0]  ;;  %v1290_v13 = vor.u32 %v1568_v6, %v1289_v5  ;;  %v1550_v14 = vld [vmem:[#allocation4 + $0x34] sm:$0xf0]  ;;  %v1417_v15 = vld [vmem:[#allocation4 + $0x1c0] sm:$0xf] }
  0x35   :  { %331 = vmatpush.bf16.msra.mxu2 %v1074_v34  ;;  %344 = vmatpush.bf16.msra.mxu3 %v1078_v35  ;;  %v1600_v16 = vld [vmem:[#allocation4 + $0x1c4] sm:$0xf0]  ;;  %v1281_v17 = vld [vmem:[#allocation4 + $0xb0] sm:$0xf]  ;;  %v1566_v18 = vld [vmem:[#allocation4 + $0xb4] sm:$0xf0]  ;;  %v1354_v19 = vor.u32 %v1584_v12, %v1353_v11  ;;  %v1218_v21 = vor.u32 %v1550_v14, %v1217_v10 }
  0x36   :  { %306 = vmatmul.bf16.vlgmr.msra.gmra.mxu0 %v95_v44  ;;  %v1209_v20 = vld [vmem:[#allocation4 + $0x20] sm:$0xf]  ;;  %v1418_v22 = vor.u32 %v1600_v16, %v1417_v15  ;;  %v1548_v23 = vld [vmem:[#allocation4 + $0x24] sm:$0xf0]  ;;  %v1345_v24 = vld [vmem:[#allocation4 + $0x130] sm:$0xf]  ;;  %v1282_v26 = vor.u32 %v1566_v18, %v1281_v17 }
  0x37   :  { %748 = vmatpush.bf16.msrb.mxu0 %v1250_v36  ;;  %319 = vmatmul.bf16.vlgmr.msra.gmra.mxu1 %v95_v44  ;;  %v1582_v25 = vld [vmem:[#allocation4 + $0x134] sm:$0xf0]  ;;  %v1273_v27 = vld [vmem:[#allocation4 + $0xa0] sm:$0xf]  ;;  %v1409_v28 = vld [vmem:[#allocation4 + $0x1b0] sm:$0xf]  ;;  %v1210_v32 = vor.u32 %v1548_v23, %v1209_v20 }
  0x38   :  { %761 = vmatpush.bf16.msrb.mxu1 %v1314_v40  ;;  %332 = vmatmul.bf16.vlgmr.msra.gmra.mxu2 %v95_v44  ;;  %v1598_v29 = vld [vmem:[#allocation4 + $0x1b4] sm:$0xf0]  ;;  %v1564_v30 = vld [vmem:[#allocation4 + $0xa4] sm:$0xf0]  ;;  %v1346_v31 = vor.u32 %v1582_v25, %v1345_v24  ;;  %v1201_v34 = vld [vmem:[#allocation4 + $0x10] sm:$0xf] }
  0x39   :  { %345 = vmatmul.bf16.vlgmr.msra.gmra.mxu3 %v95_v44  ;;  %774 = vmatpush.bf16.msrb.mxu2 %v1378_v47  ;;  %v1410_v33 = vor.u32 %v1598_v29, %v1409_v28  ;;  %v1337_v35 = vld [vmem:[#allocation4 + $0x120] sm:$0xf]  ;;  %v1580_v36 = vld [vmem:[#allocation4 + $0x124] sm:$0xf0]  ;;  %v1274_v37 = vor.u32 %v1564_v30, %v1273_v27  ;;  %v1546_v38 = vld [vmem:[#allocation4 + $0x14] sm:$0xf0] }
  0x3a   :  { %787 = vmatpush.bf16.msrb.mxu3 %v1442_v49  ;;  %v1401_v39 = vld [vmem:[#allocation4 + $0x1a0] sm:$0xf]  ;;  %v1596_v40 = vld [vmem:[#allocation4 + $0x1a4] sm:$0xf0]  ;;  %v1265_v41 = vld [vmem:[#allocation4 + $0x90] sm:$0xf]  ;;  %v1338_v43 = vor.u32 %v1580_v36, %v1337_v35  ;;  %v1202_v45 = vor.u32 %v1546_v38, %v1201_v34 }
  0x3b   :  { %749 = vmatpush.bf16.msrb.mxu0 %v1242_v48  ;;  %v1562_v42 = vld [vmem:[#allocation4 + $0x94] sm:$0xf0]  ;;  %v1193_v44 = vld [vmem:[#allocation4] sm:$0xf]  ;;  %v1402_v46 = vor.u32 %v1596_v40, %v1401_v39  ;;  %v1544_v47 = vld [vmem:[#allocation4 + $0x4] sm:$0xf0] }
  0x3c   :  { %762 = vmatpush.bf16.msrb.mxu1 %v1306_v53  ;;  %v1329_v48 = vld [vmem:[#allocation4 + $0x110] sm:$0xf]  ;;  %v1578_v49 = vld [vmem:[#allocation4 + $0x114] sm:$0xf0]  ;;  %v1266_v50 = vor.u32 %v1562_v42, %v1265_v41  ;;  %v1257_v51 = vld [vmem:[#allocation4 + $0x80] sm:$0xf] }
  0x3d   :  { %775 = vmatpush.bf16.msrb.mxu2 %v1370_v59  ;;  %v1393_v52 = vld [vmem:[#allocation4 + $0x190] sm:$0xf]  ;;  %v1594_v53 = vld [vmem:[#allocation4 + $0x194] sm:$0xf0]  ;;  %v1560_v54 = vld [vmem:[#allocation4 + $0x84] sm:$0xf0]  ;;  %v1330_v59 = vor.u32 %v1578_v49, %v1329_v48 }
  0x3e   :  { %788 = vmatpush.bf16.msrb.mxu3 %v1434_v61  ;;  %v1557_v55 = vld [vmem:[#allocation4 + $0x74] sm:$0xf]  ;;  %v1251_v56 = vld [vmem:[#allocation4 + $0x78] sm:$0xf0]  ;;  %v1394_v61 = vor.u32 %v1594_v53, %v1393_v52  ;;  %v1555_v62 = vld [vmem:[#allocation4 + $0x64] sm:$0xf]  ;;  %v1258_v2 = vor.u32 %v1560_v54, %v1257_v51 }
  0x3f   :  { %750 = vmatpush.bf16.msrb.mxu0 %v1234_v60  ;;  %v1573_v57 = vld [vmem:[#allocation4 + $0xf4] sm:$0xf]  ;;  %v1315_v58 = vld [vmem:[#allocation4 + $0xf8] sm:$0xf0]  ;;  %v1194_v60 = vor.u32 %v1544_v47, %v1193_v44  ;;  %v1321_v63 = vld [vmem:[#allocation4 + $0x100] sm:$0xf]  ;;  %v1254_v3 = vor.u32 %v1557_v55, %v1251_v56 }
  0x40   :  { %763 = vmatpush.bf16.msrb.mxu1 %v1298_v1  ;;  %v1576_v0 = vld [vmem:[#allocation4 + $0x104] sm:$0xf0]  ;;  %v1385_v1 = vld [vmem:[#allocation4 + $0x180] sm:$0xf]  ;;  %v1589_v5 = vld [vmem:[#allocation4 + $0x174] sm:$0xf] }
  0x41   :  { %776 = vmatpush.bf16.msrb.mxu2 %v1362_v7  ;;  %v1592_v4 = vld [vmem:[#allocation4 + $0x184] sm:$0xf0]  ;;  %v1379_v6 = vld [vmem:[#allocation4 + $0x178] sm:$0xf0]  ;;  %v1318_v7 = vor.u32 %v1573_v57, %v1315_v58  ;;  %v1571_v11 = vld [vmem:[#allocation4 + $0xe4] sm:$0xf] }
  0x42   :  { %789 = vmatpush.bf16.msrb.mxu3 %v1426_v9  ;;  %v1605_v9 = vld [vmem:[#allocation4 + $0x1f4] sm:$0xf]  ;;  %v1443_v10 = vld [vmem:[#allocation4 + $0x1f8] sm:$0xf0]  ;;  %v1307_v12 = vld [vmem:[#allocation4 + $0xe8] sm:$0xf0]  ;;  %v1386_v14 = vor.u32 %v1592_v4, %v1385_v1  ;;  %v1382_v15 = vor.u32 %v1589_v5, %v1379_v6 }
  0x43   :  { %751 = vmatpush.bf16.msrb.mxu0 %v1226_v8  ;;  %v1243_v8 = vld [vmem:[#allocation4 + $0x68] sm:$0xf0]  ;;  %v1446_v17 = vor.u32 %v1605_v9, %v1443_v10  ;;  %v1310_v18 = vor.u32 %v1571_v11, %v1307_v12  ;;  %v1235_v20 = vld [vmem:[#allocation4 + $0x58] sm:$0xf0]  ;;  %v1587_v25 = vld [vmem:[#allocation4 + $0x164] sm:$0xf] }
  0x44   :  { %764 = vmatpush.bf16.msrb.mxu1 %v1290_v13  ;;  %v1322_v13 = vor.u32 %v1576_v0, %v1321_v63  ;;  %v1246_v16 = vor.u32 %v1555_v62, %v1243_v8  ;;  %v1299_v23 = vld [vmem:[#allocation4 + $0xd8] sm:$0xf0]  ;;  %v1603_v28 = vld [vmem:[#allocation4 + $0x1e4] sm:$0xf]  ;;  %v1435_v29 = vld [vmem:[#allocation4 + $0x1e8] sm:$0xf0] }
  0x45   :  { %777 = vmatpush.bf16.msrb.mxu2 %v1354_v19  ;;  %v1553_v19 = vld [vmem:[#allocation4 + $0x54] sm:$0xf]  ;;  %v1438_v30 = vor.u32 %v1603_v28, %v1435_v29  ;;  %v1291_v35 = vld [vmem:[#allocation4 + $0xc8] sm:$0xf0]  ;;  %v1363_v38 = vld [vmem:[#allocation4 + $0x158] sm:$0xf0] }
  0x46   :  { %790 = vmatpush.bf16.msrb.mxu3 %v1418_v22  ;;  %v1238_v22 = vor.u32 %v1553_v19, %v1235_v20  ;;  %v1601_v39 = vld [vmem:[#allocation4 + $0x1d4] sm:$0xf]  ;;  %v1427_v41 = vld [vmem:[#allocation4 + $0x1d8] sm:$0xf0]  ;;  %v1583_v49 = vld [vmem:[#allocation4 + $0x144] sm:$0xf] }
  0x47   :  { %752 = vmatpush.bf16.msrb.mxu0 %v1218_v21  ;;  %v1569_v21 = vld [vmem:[#allocation4 + $0xd4] sm:$0xf]  ;;  %v1430_v42 = vor.u32 %v1601_v39, %v1427_v41  ;;  %v1219_v44 = vld [vmem:[#allocation4 + $0x38] sm:$0xf0]  ;;  %v1599_v51 = vld [vmem:[#allocation4 + $0x1c4] sm:$0xf] }
  0x48   :  { %765 = vmatpush.bf16.msrb.mxu1 %v1282_v26  ;;  %v1302_v24 = vor.u32 %v1569_v21, %v1299_v23  ;;  %v1371_v26 = vld [vmem:[#allocation4 + $0x168] sm:$0xf0]  ;;  %v1283_v47 = vld [vmem:[#allocation4 + $0xb8] sm:$0xf0]  ;;  %v1547_v55 = vld [vmem:[#allocation4 + $0x24] sm:$0xf] }
  0x49   :  { %778 = vmatpush.bf16.msrb.mxu2 %v1346_v31  ;;  %v1374_v27 = vor.u32 %v1587_v25, %v1371_v26  ;;  %v1551_v31 = vld [vmem:[#allocation4 + $0x44] sm:$0xf]  ;;  %v1419_v53 = vld [vmem:[#allocation4 + $0x1c8] sm:$0xf0]  ;;  %v1347_v62 = vld [vmem:[#allocation4 + $0x138] sm:$0xf0] }
  0x4a   :  { %791 = vmatpush.bf16.msrb.mxu3 %v1410_v33  ;;  %v1567_v33 = vld [vmem:[#allocation4 + $0xc4] sm:$0xf]  ;;  %v1422_v54 = vor.u32 %v1599_v51, %v1419_v53  ;;  %v1211_v56 = vld [vmem:[#allocation4 + $0x28] sm:$0xf0]  ;;  %v1597_v63 = vld [vmem:[#allocation4 + $0x1b4] sm:$0xf] }
  0x4b   :  { %753 = vmatpush.bf16.msrb.mxu0 %v1210_v32  ;;  %v1227_v32 = vld [vmem:[#allocation4 + $0x48] sm:$0xf0]  ;;  %v1294_v36 = vor.u32 %v1567_v33, %v1291_v35  ;;  %v1563_v57 = vld [vmem:[#allocation4 + $0xa4] sm:$0xf]  ;;  %v1214_v58 = vor.u32 %v1547_v55, %v1211_v56  ;;  %v1411_v1 = vld [vmem:[#allocation4 + $0x1b8] sm:$0xf0] }
  0x4c   :  { %766 = vmatpush.bf16.msrb.mxu1 %v1274_v37  ;;  %v1230_v34 = vor.u32 %v1551_v31, %v1227_v32  ;;  %v1585_v37 = vld [vmem:[#allocation4 + $0x154] sm:$0xf]  ;;  %v1203_v4 = vld [vmem:[#allocation4 + $0x18] sm:$0xf0]  ;;  %v1579_v8 = vld [vmem:[#allocation4 + $0x124] sm:$0xf] }
  0x4d   :  { %779 = vmatpush.bf16.msrb.mxu2 %v1338_v43  ;;  %v1366_v40 = vor.u32 %v1585_v37, %v1363_v38  ;;  %v1549_v43 = vld [vmem:[#allocation4 + $0x34] sm:$0xf]  ;;  %v1339_v9 = vld [vmem:[#allocation4 + $0x128] sm:$0xf0]  ;;  %v1595_v12 = vld [vmem:[#allocation4 + $0x1a4] sm:$0xf] }
  0x4e   :  { %792 = vmatpush.bf16.msrb.mxu3 %v1402_v46  ;;  %v1565_v46 = vld [vmem:[#allocation4 + $0xb4] sm:$0xf]  ;;  %v1342_v11 = vor.u32 %v1579_v8, %v1339_v9  ;;  %v1395_v25 = vld [vmem:[#allocation4 + $0x198] sm:$0xf0]  ;;  %v1323_v28 = vld [vmem:[#allocation4 + $0x108] sm:$0xf0] }
  0x4f   :  { %754 = vmatpush.bf16.msrb.mxu0 %v1202_v45  ;;  %v1222_v45 = vor.u32 %v1549_v43, %v1219_v44  ;;  %v1286_v48 = vor.u32 %v1565_v46, %v1283_v47  ;;  %v1561_v5 = vld [vmem:[#allocation4 + $0x94] sm:$0xf]  ;;  %v1591_v29 = vld [vmem:[#allocation4 + $0x184] sm:$0xf]  ;;  %v1387_v31 = vld [vmem:[#allocation4 + $0x188] sm:$0xf0] }
  0x50   :  { %767 = vmatpush.bf16.msrb.mxu1 %v1266_v50  ;;  %v1355_v50 = vld [vmem:[#allocation4 + $0x148] sm:$0xf0]  ;;  %v1577_v21 = vld [vmem:[#allocation4 + $0x114] sm:$0xf]  ;;  %v128_v32 = vld [vmem:[%s1829_s2] sm:$0xf]  ;;  %v1390_v33 = vor.u32 %v1591_v29, %v1387_v31 }
  0x51   :  { %780 = vmatpush.bf16.msrb.mxu2 %v1330_v59  ;;  %v1358_v52 = vor.u32 %v1583_v49, %v1355_v50  ;;  %v1275_v59 = vld [vmem:[#allocation4 + $0xa8] sm:$0xf0]  ;;  %v1593_v23 = vld [vmem:[#allocation4 + $0x194] sm:$0xf]  ;;  %v131_v35 = vperm.slane %v128_v32, 1  ;;  %v1614_v43 = vld [vmem:[#allocation6 + $0x38] sm:$0xff] }
  0x52   :  { %793 = vmatpush.bf16.msrb.mxu3 %v1394_v61  ;;  %v1581_v61 = vld [vmem:[#allocation4 + $0x134] sm:$0xf]  ;;  %v1398_v26 = vor.u32 %v1593_v23, %v1395_v25  ;;  %v1616_v8 = vld [vmem:[#allocation6 + $0x48] sm:$0xff]  ;;  %v422_v9 = vld [vmem:[%s1831_s4] sm:$0x3] }
  0x53   :  { %755 = vmatpush.bf16.msrb.mxu0 %v1194_v60  ;;  %v1278_v60 = vor.u32 %v1563_v57, %v1275_v59  ;;  %v1350_v0 = vor.u32 %v1581_v61, %v1347_v62  ;;  %v1613_v51 = vld [vmem:[#allocation6 + $0x30] sm:$0xff]  ;;  %v1612_v57 = vld [vmem:[#allocation6 + $0x28] sm:$0xff]  ;;  %v1611_v61 = vld [vmem:[#allocation6 + $0x20] sm:$0xff]  ;;  %v425_v31 = vperm.slane %v422_v9, 1 }
  0x54   :  { %768 = vmatpush.bf16.msrb.mxu1 %v1258_v2  ;;  %v1414_v2 = vor.u32 %v1597_v63, %v1411_v1  ;;  %v1622_v62 = vld [vmem:[#allocation6 + $0x78] sm:$0xff]  ;;  %v1621_v1 = vld [vmem:[#allocation6 + $0x70] sm:$0xff] }
  0x55   :  { %781 = vmatpush.bf16.msrb.mxu2 %v1322_v13  ;;  %v1403_v13 = vld [vmem:[#allocation4 + $0x1a8] sm:$0xf0]  ;;  %v1610_v63 = vld [vmem:[#allocation6 + $0x18] sm:$0xff] }
  0x56   :  { %794 = vmatpush.bf16.msrb.mxu3 %v1386_v14  ;;  %v1543_v14 = vld [vmem:[#allocation4 + $0x4] sm:$0xf] }
  0x57   :  { %800 = vmatpush.bf16.msra.mxu0 %v1254_v3  ;;  %v1545_v3 = vld [vmem:[#allocation4 + $0x14] sm:$0xf] }
  0x58   :  { %813 = vmatpush.bf16.msra.mxu1 %v1318_v7  ;;  %v1206_v6 = vor.u32 %v1545_v3, %v1203_v4  ;;  %v1267_v7 = vld [vmem:[#allocation4 + $0x98] sm:$0xf0]  ;;  %v1620_v3 = vld [vmem:[#allocation6 + $0x68] sm:$0xff]  ;;  %v1607_v4 = vld [vmem:[#allocation6] sm:$0xff] }
  0x59   :  { %826 = vmatpush.bf16.msra.mxu2 %v1382_v15  ;;  %v1270_v10 = vor.u32 %v1561_v5, %v1267_v7  ;;  %v1406_v15 = vor.u32 %v1595_v12, %v1403_v13  ;;  %v1619_v5 = vld [vmem:[#allocation6 + $0x60] sm:$0xff]  ;;  %v1617_v7 = vld [vmem:[#allocation6 + $0x50] sm:$0xff]  ;;  %v424_v12 = vperm.slane %v422_v9, 0 }
  0x5a   :  { %839 = vmatpush.bf16.msra.mxu3 %v1446_v17  ;;  %v1559_v17 = vld [vmem:[#allocation4 + $0x84] sm:$0xf] }
  0x5b   :  { %801 = vmatpush.bf16.msra.mxu0 %v1246_v16  ;;  %v1195_v16 = vld [vmem:[#allocation4 + $0x8] sm:$0xf0]  ;;  %v1615_v13 = vld [vmem:[#allocation6 + $0x40] sm:$0xff] }
  0x5c   :  { %814 = vmatpush.bf16.msra.mxu1 %v1310_v18  ;;  %v1259_v18 = vld [vmem:[#allocation4 + $0x88] sm:$0xf0]  ;;  %v1198_v19 = vor.u32 %v1543_v14, %v1195_v16  ;;  %v1029_v16 = vld [vmem:[#allocation7 + $0x70] sm:$0xff] }
  0x5d   :  { %827 = vmatpush.bf16.msra.mxu2 %v1374_v27  ;;  %v1262_v20 = vor.u32 %v1559_v17, %v1259_v18  ;;  %v1575_v27 = vld [vmem:[#allocation4 + $0x104] sm:$0xf]  ;;  %v1028_v18 = vld [vmem:[#allocation7 + $0x68] sm:$0xff] }
  0x5e   :  { %840 = vmatpush.bf16.msra.mxu3 %v1438_v30  ;;  %v1326_v30 = vor.u32 %v1575_v27, %v1323_v28 }
  0x5f   :  { %802 = vmatpush.bf16.msra.mxu0 %v1238_v22  ;;  %v1331_v22 = vld [vmem:[#allocation4 + $0x118] sm:$0xf0] }
  0x60   :  { %815 = vmatpush.bf16.msra.mxu1 %v1302_v24  ;;  %v1334_v24 = vor.u32 %v1577_v21, %v1331_v22  ;;  %v1027_v21 = vld [vmem:[#allocation7 + $0x60] sm:$0xff]  ;;  %v1026_v22 = vld [vmem:[#allocation7 + $0x58] sm:$0xff] }
  0x61   :  { %828 = vmatpush.bf16.msra.mxu2 %v1366_v40 }
  0x62   :  { %841 = vmatpush.bf16.msra.mxu3 %v1430_v42  ;;  %v132_v42 = vperm.slane %v128_v32, 2 }
  0x63   :  { %803 = vmatpush.bf16.msra.mxu0 %v1230_v34  ;;  %v130_v34 = vperm.slane %v128_v32, 0 }
  0x64   :  { %816 = vmatpush.bf16.msra.mxu1 %v1294_v36 }
  0x65   :  { %829 = vmatpush.bf16.msra.mxu2 %v1358_v52 }
  0x66   :  { %842 = vmatpush.bf16.msra.mxu3 %v1422_v54 }
  0x67   :  { %804 = vmatpush.bf16.msra.mxu0 %v1222_v45  ;;  %v133_v45 = vperm.slane %v128_v32, 3 }
  0x68   :  { %817 = vmatpush.bf16.msra.mxu1 %v1286_v48 }
  0x69   :  { %830 = vmatpush.bf16.msra.mxu2 %v1350_v0  ;;  %v1609_v0 = vld [vmem:[#allocation6 + $0x10] sm:$0xff] }
  0x6a   :  { %843 = vmatpush.bf16.msra.mxu3 %v1414_v2  ;;  %v1608_v2 = vld [vmem:[#allocation6 + $0x8] sm:$0xff] }
  0x6b   :  { %805 = vmatpush.bf16.msra.mxu0 %v1214_v58 }
  0x6c   :  { %818 = vmatpush.bf16.msra.mxu1 %v1278_v60 }
  0x6d   :  { %831 = vmatpush.bf16.msra.mxu2 %v1342_v11 }
  0x6e   :  { %844 = vmatpush.bf16.msra.mxu3 %v1406_v15  ;;  %v1030_v15 = vld [vmem:[#allocation7 + $0x78] sm:$0xff] }
  0x6f   :  { %806 = vmatpush.bf16.msra.mxu0 %v1206_v6  ;;  %v1618_v6 = vld [vmem:[#allocation6 + $0x58] sm:$0xff] }
  0x70   :  { %819 = vmatpush.bf16.msra.mxu1 %v1270_v10 }
  0x71   :  { %832 = vmatpush.bf16.msra.mxu2 %v1334_v24 }
  0x72   :  { %845 = vmatpush.bf16.msra.mxu3 %v1398_v26 }
  0x73   :  { %807 = vmatpush.bf16.msra.mxu0 %v1198_v19 }
  0x74   :  { %820 = vmatpush.bf16.msra.mxu1 %v1262_v20 }
  0x75   :  { %833 = vmatpush.bf16.msra.mxu2 %v1326_v30 }
  0x76   :  { %846 = vmatpush.bf16.msra.mxu3 %v1390_v33 }
  0xb3   :  { %v307_v36 = vpop.f32.mrf.mxu0 }
  0xb4   :  { %v308_v37 = vadd.f32 %v307_v36, %v130_v34  ;;  %v320_v38 = vpop.f32.mrf.mxu1 }
  0xb5   :  { %v321_v39 = vadd.f32 %v320_v38, %v131_v35 }
  0xb6   :  { %v350_v40 = vmax.f32 %v308_v37, 0.0 }
  0xb7   :  { %v351_v41 = vmax.f32 %v321_v39, 0.0 }
  0xb8   :  { %v354_v44 = vpack.c.bf16 %v350_v40, %v350_v40 }
  0xb9   :  { %v355_v46 = vpack.c.bf16 %v351_v41, %v351_v41 }
  0xba   :  { %756 = vmatmul.bf16.vlgmr.msrb.gmra.mxu0 %v354_v44 }
  0xbb   :  { %v333_v47 = vpop.f32.mrf.mxu2  ;;  %769 = vmatmul.bf16.vlgmr.msrb.gmra.mxu1 %v355_v46  ;;  %v309_v50 = vpop.f32.mrf.mxu0  ;;  %988 = vmatpush.bf16.msrb.mxu0 %v1614_v43 }
  0xbc   :  { %v334_v48 = vadd.f32 %v333_v47, %v132_v42  ;;  %v346_v49 = vpop.f32.mrf.mxu3  ;;  %v322_v53 = vpop.f32.mrf.mxu1  ;;  %1001 = vmatpush.bf16.msrb.mxu1 %v1622_v62  ;;  %v1024_v47 = vld [vmem:[#allocation7 + $0x48] sm:$0xff]  ;;  %v1021_v50 = vld [vmem:[#allocation7 + $0x30] sm:$0xff] }
  0xbd   :  { %v347_v52 = vadd.f32 %v346_v49, %v133_v45  ;;  %v1022_v49 = vld [vmem:[#allocation7 + $0x38] sm:$0xff] }
  0xbe   :  { %v352_v54 = vmax.f32 %v334_v48, 0.0  ;;  %v1023_v48 = vld [vmem:[#allocation7 + $0x40] sm:$0xff]  ;;  %v1018_v53 = vld [vmem:[#allocation7 + $0x18] sm:$0xff] }
  0xbf   :  { %v353_v55 = vmax.f32 %v347_v52, 0.0  ;;  %989 = vmatpush.bf16.msrb.mxu0 %v1613_v51  ;;  %v1020_v51 = vld [vmem:[#allocation7 + $0x28] sm:$0xff]  ;;  %v1019_v52 = vld [vmem:[#allocation7 + $0x20] sm:$0xff] }
  0xc0   :  { %v356_v56 = vpack.c.bf16 %v352_v54, %v352_v54  ;;  %1002 = vmatpush.bf16.msrb.mxu1 %v1621_v1  ;;  %v1017_v54 = vld [vmem:[#allocation7 + $0x10] sm:$0xff]  ;;  %v1634_v1 = vld [vmem:[%s1835_s8] ss:$0 sm:$0xff] }
  0xc1   :  { %v357_v58 = vpack.c.bf16 %v353_v55, %v353_v55  ;;  %v1016_v55 = vld [vmem:[#allocation7 + $0x8] sm:$0xff] }
  0xc2   :  { %782 = vmatmul.bf16.vlgmr.msrb.gmra.mxu2 %v356_v56 }
  0xc3   :  { %795 = vmatmul.bf16.vlgmr.msrb.gmra.mxu3 %v357_v58  ;;  %v335_v59 = vpop.f32.mrf.mxu2  ;;  %990 = vmatpush.bf16.msrb.mxu0 %v1612_v57 }
  0xc4   :  { %v348_v60 = vpop.f32.mrf.mxu3  ;;  %1003 = vmatpush.bf16.msrb.mxu1 %v1620_v3  ;;  %1035 = vmatpush.msrb.mxu2 %v1030_v15  ;;  %v1633_v59 = vld [vmem:[%s1833_s6] ss:$0 sm:$0xff] }
  0xc6   :  { %1036 = vmatpush.msrb.mxu2 %v1029_v16 }
  0xc7   :  { %991 = vmatpush.bf16.msrb.mxu0 %v1611_v61 }
  0xc8   :  { %1004 = vmatpush.bf16.msrb.mxu1 %v1619_v5  ;;  %1037 = vmatpush.msrb.mxu2 %v1028_v18 }
  0xca   :  { %808 = vmatmul.bf16.vlgmr.msra.gmra.mxu0 %v354_v44  ;;  %1038 = vmatpush.msrb.mxu2 %v1027_v21 }
  0xcb   :  { %821 = vmatmul.bf16.vlgmr.msra.gmra.mxu1 %v355_v46  ;;  %992 = vmatpush.bf16.msrb.mxu0 %v1610_v63  ;;  %v1025_v46 = vld [vmem:[#allocation7 + $0x50] sm:$0xff] }
  0xcc   :  { %1005 = vmatpush.bf16.msrb.mxu1 %v1618_v6  ;;  %1039 = vmatpush.msrb.mxu2 %v1026_v22 }
  0xce   :  { %1040 = vmatpush.msrb.mxu2 %v1025_v46 }
  0xcf   :  { %993 = vmatpush.bf16.msrb.mxu0 %v1609_v0 }
  0xd0   :  { %1006 = vmatpush.bf16.msrb.mxu1 %v1617_v7  ;;  %1041 = vmatpush.msrb.mxu2 %v1024_v47 }
  0xd2   :  { %834 = vmatmul.bf16.vlgmr.msra.gmra.mxu2 %v356_v56  ;;  %v1015_v56 = vld [vmem:[#allocation7] sm:$0xff] }
  0xd3   :  { %847 = vmatmul.bf16.vlgmr.msra.gmra.mxu3 %v357_v58  ;;  %994 = vmatpush.bf16.msrb.mxu0 %v1608_v2 }
  0xd4   :  { %1007 = vmatpush.bf16.msrb.mxu1 %v1616_v8  ;;  %1042 = vmatpush.msrb.mxu2 %v1023_v48 }
  0xd6   :  { %1043 = vmatpush.msrb.mxu2 %v1022_v49 }
  0xd7   :  { %995 = vmatpush.bf16.msrb.mxu0 %v1607_v4 }
  0xd8   :  { %1008 = vmatpush.bf16.msrb.mxu1 %v1615_v13  ;;  %1044 = vmatpush.msrb.mxu2 %v1021_v50 }
  0xda   :  { %1045 = vmatpush.msrb.mxu2 %v1020_v51 }
  0xdc   :  { %1046 = vmatpush.msrb.mxu2 %v1019_v52 }
  0xde   :  { %1047 = vmatpush.msrb.mxu2 %v1018_v53 }
  0xe0   :  { %1048 = vmatpush.msrb.mxu2 %v1017_v54 }
  0xe2   :  { %1049 = vmatpush.msrb.mxu2 %v1016_v55 }
  0xe4   :  { %1050 = vmatpush.msrb.mxu2 %v1015_v56 }
 0x137   :  { %v757_v10 = vpop.f32.mrf.mxu0 }
 0x138   :  { %v770_v11 = vpop.f32.mrf.mxu1  ;;  %v758_v14 = vadd.f32 %v757_v10, %v424_v12 }
 0x13a   :  { %v771_v20 = vadd.f32 %v770_v11, %v758_v14 }
 0x13f   :  { %v759_v17 = vpop.f32.mrf.mxu0 }
 0x140   :  { %v772_v19 = vpop.f32.mrf.mxu1 }
 0x145   :  { %v783_v23 = vpop.f32.mrf.mxu2 }
 0x146   :  { %v784_v24 = vadd.f32 %v783_v23, %v771_v20  ;;  %v796_v25 = vpop.f32.mrf.mxu3 }
 0x147   :  { %v809_v27 = vpop.f32.mrf.mxu0 }
 0x148   :  { %v797_v26 = vadd.f32 %v796_v25, %v784_v24  ;;  %v822_v28 = vpop.f32.mrf.mxu1  ;;  %v810_v34 = vadd.f32 %v809_v27, %v425_v31 }
 0x14a   :  { %v852_v29 = vmax.f32 %v797_v26, 0.0  ;;  %v823_v37 = vadd.f32 %v822_v28, %v810_v34 }
 0x14c   :  { %v854_v30 = vpack.c.bf16 %v852_v29, %v852_v29 }
 0x14d   :  { %v785_v32 = vpop.f32.mrf.mxu2 }
 0x14e   :  { %v798_v33 = vpop.f32.mrf.mxu3  ;;  %996 = vmatmul.bf16.vlgmr.msrb.gmra.mxu0 %v854_v30 }
 0x14f   :  { %v811_v35 = vpop.f32.mrf.mxu0 }
 0x150   :  { %v824_v36 = vpop.f32.mrf.mxu1 }
 0x155   :  { %v835_v38 = vpop.f32.mrf.mxu2 }
 0x156   :  { %v836_v39 = vadd.f32 %v835_v38, %v823_v37  ;;  %v848_v40 = vpop.f32.mrf.mxu3 }
 0x158   :  { %v849_v41 = vadd.f32 %v848_v40, %v836_v39 }
 0x15a   :  { %v853_v42 = vmax.f32 %v849_v41, 0.0 }
 0x15c   :  { %v855_v43 = vpack.c.bf16 %v853_v42, %v853_v42 }
 0x15d   :  { %v837_v44 = vpop.f32.mrf.mxu2 }
 0x15e   :  { %v850_v45 = vpop.f32.mrf.mxu3  ;;  %1009 = vmatmul.bf16.vlgmr.msrb.gmra.mxu1 %v855_v43 }
 0x1cb   :  { %v997_v57 = vpop.f32.mrf.mxu0 }
 0x1cc   :  { %v998_v60 = vadd.f32 %v1633_v59, %v997_v57 }
 0x1d3   :  { %v999_v58 = vpop.f32.mrf.mxu0 }
 0x1db   :  { %v1010_v61 = vpop.f32.mrf.mxu1 }
 0x1dc   :  { %v1011_v62 = vadd.f32 %v1010_v61, %v998_v60 }
 0x1de   :  { %v1014_v63 = vmax.f32 %v1011_v62, 0.0 }
 0x1e0   :  { %1051 = vmatmul.f32.vlgmr.msrb.gmra.mxu2 %v1014_v63 }
 0x1e3   :  { %v1012_v0 = vpop.f32.mrf.mxu1 }
 0x263   :  { %v1052_v2 = vpop.f32.mrf.mxu2 }
 0x264   :  { %v1053_v3 = vadd.f32 %v1634_v1, %v1052_v2 }
 0x266   :  { %1055 = vst [vmem:[%s1836_s9] sm:$0xff] %v1053_v3 }
 0x267   :  { %1060 = vsyncpa [#allocation3], 1 }
 0x268   :  { %1061 = vsyncpa [#allocation5], 1 }
 0x269   :  { %1062 = vsyncpa [#allocation8], 1 }

</bundles_post_ra>
